<compile_context>
chip_gen: v7x
topology: tpu7x:2x2x1
jax: 0.10.0
libtpu: 0.0.40
codegen_flags: <defaults>
</compile_context>

<pallas_src>
import jax
import jax.numpy as jnp
import numpy as np
from jax import lax
from jax.experimental import pallas as pl
from jax.experimental.pallas import tpu as pltpu

# ----------------------------- hyperparameters -----------------------------
CHAR_VOCAB_SIZE = 50
CHAR_EMB_DIM = 32          # char_emb_dim (Conv1d in_channels)
KERNEL_SIZES = (2, 3, 4)   # kernel_sizes (ascending)
NUM_KERNELS = 16           # num_kernels (Conv1d out_channels)
HIDDEN = 768               # highway output dim (fixed in the module)
FEAT = len(KERNEL_SIZES) * NUM_KERNELS   # 48

BATCH = 2
SEQ_LEN = 16               # char sequence length

K_MAX = max(KERNEL_SIZES)  # 4
V_PAD = 64                 # vocab padded to a lane-friendly size (>= vocab)
LANE = 128                 # per-tap / feature lane block width
BIAS_LANE = FEAT           # constant-1.0 lane that carries the highway bias
NEG = -1e9                 # additive mask (pre-ReLU) for invalid positions

assert V_PAD >= CHAR_VOCAB_SIZE
assert FEAT + 1 <= LANE
assert K_MAX * CHAR_EMB_DIM <= LANE  # keep one MXU contraction pass per tap block


# ------------------------------- Pallas kernel ------------------------------
def charcnn_kernel(ids_ref, consts_ref, bm_ref, out_ref):
    # ids_ref:    (B*L, 1) int32     flattened char ids
    # consts_ref: (V_PAD + LANE, W) bf16
    #               rows [0:V_PAD, 0:K_MAX*LANE] : folded emb@conv weights, tap-blocked
    #               rows [V_PAD:,  0:HIDDEN]     : highway weight (row FEAT = bias)
    # bm_ref:     (B*L, LANE) f32    conv bias | -1e9 invalid mask | 1.0 bias lane
    # out_ref:    (B, HIDDEN) f32
    B, H = out_ref.shape
    BL = ids_ref.shape[0]
    L = BL // B

    # 1) one-hot char ids (exact in bf16) -> single MXU pass against the folded
    #    embedding x conv-tap weights for all taps / kernel sizes / batch rows.
    ids = ids_ref[...]                                            # (BL, 1) i32
    lane_iota = lax.broadcasted_iota(jnp.int32, (BL, V_PAD), 1)
    one_hot = (ids == lane_iota).astype(jnp.bfloat16)             # (BL, V_PAD)
    taps = jnp.dot(one_hot, consts_ref[:V_PAD, :K_MAX * LANE],
                   preferred_element_type=jnp.float32)            # (BL, K_MAX*LANE) f32

    # 2) combine taps: z[n] = sum_j taps[n + j, tap-block j]. Sublane rolls run on
    #    the XLU; cross-batch wrap rows are masked below, out-of-range taps hit
    #    zero weight columns, so the wrap is exact.
    z = taps[:, :LANE]
    for j in range(1, K_MAX):
        z = z + pltpu.roll(taps[:, j * LANE:(j + 1) * LANE], shift=BL - j, axis=0)

    # 3) fused conv-bias / -1e9 invalid-position mask / 1.0 highway-bias lane, ReLU.
    z = jnp.maximum(z + bm_ref[...], 0.0)                         # (BL, LANE) f32

    # 4) max-pool over time per batch row (masked rows are 0 and can't win).
    feats = jnp.max(z.reshape(B, L, LANE), axis=1)                # (B, LANE) f32

    # 5) highway Linear (+ bias via the constant-1.0 lane); single lane-dense store.
    out_ref[...] = jnp.dot(feats.astype(jnp.bfloat16),
                           consts_ref[V_PAD:V_PAD + LANE, :H],
                           preferred_element_type=jnp.float32).astype(out_ref.dtype)


# ------------------------- parameter packing (one-time) ----------------------
def pack_params(emb_table, conv_ws, conv_bs, wh, bh, batch, seq_len):
    """Done once at setup, OUTSIDE the jitted per-call path (numpy)."""
    E = CHAR_EMB_DIM
    emb = np.zeros((V_PAD, E), np.float32)
    emb[:CHAR_VOCAB_SIZE] = np.asarray(emb_table, np.float32)

    # Fold embedding into each conv tap: M_j[v, g*O+o] = sum_e emb[v,e] * w_g[o,e,j]
    m_packed = np.zeros((V_PAD, K_MAX * LANE), np.float32)
    for j in range(K_MAX):
        for g, (w, k) in enumerate(zip(conv_ws, KERNEL_SIZES)):
            if j < k:
                w_j = np.asarray(w, np.float32)[:, :, j].T        # (E, O)
                c0 = j * LANE + g * NUM_KERNELS
                m_packed[:, c0:c0 + NUM_KERNELS] = emb @ w_j      # (V_PAD, O), f32

    # Highway weight padded to a 128-row contraction; row BIAS_LANE carries the bias.
    wh_pad = np.zeros((LANE, HIDDEN), np.float32)
    wh_pad[:FEAT] = np.asarray(wh, np.float32).T                  # (FEAT, HIDDEN)
    wh_pad[BIAS_LANE] = np.asarray(bh, np.float32)

    # Single bf16 constant slab (one DMA): folded conv weights on top, highway below.
    width = max(K_MAX * LANE, HIDDEN)
    consts = np.zeros((V_PAD + LANE, width), np.float32)
    consts[:V_PAD, :K_MAX * LANE] = m_packed
    consts[V_PAD:, :HIDDEN] = wh_pad
    consts = jnp.asarray(consts, jnp.bfloat16)

    # Fused conv-bias / invalid-position mask / highway-bias-lane slab (f32).
    bl = batch * seq_len
    bm = np.full((bl, LANE), NEG, np.float32)
    for n in range(bl):
        p = n % seq_len
        for g, k in enumerate(KERNEL_SIZES):
            if p <= seq_len - k:                                   # valid conv position
                bm[n, g * NUM_KERNELS:(g + 1) * NUM_KERNELS] = np.asarray(conv_bs[g],
                                                                          np.float32)
    bm[:, BIAS_LANE] = 1.0
    return consts, jnp.asarray(bm)


# --------------------------------- wrapper ----------------------------------
@jax.jit
def charcnn_forward(char_ids, consts, bm):
    B, L = char_ids.shape
    ids = char_ids.reshape(B * L, 1).astype(jnp.int32)
    vmem = pl.BlockSpec(memory_space=pltpu.MemorySpace.VMEM)
    return pl.pallas_call(
        charcnn_kernel,
        out_shape=jax.ShapeDtypeStruct((B, HIDDEN), jnp.float32),
        in_specs=[vmem, vmem, vmem],
        out_specs=vmem,
    )(ids, consts, bm)


# ------------------------------ pure-JAX reference ---------------------------
def charcnn_reference(char_ids, emb_table, conv_ws, conv_bs, wh, bh):
    emb = jnp.take(emb_table, char_ids, axis=0)          # (B, L, E)
    x = jnp.transpose(emb, (0, 2, 1))                    # (B, E, L)  == PyTorch NCL
    pooled = []
    for w, b in zip(conv_ws, conv_bs):                   # w: (O, E, k), b: (O,)
        out = jax.lax.conv_general_dilated(
            x, w, window_strides=(1,), padding="VALID",
            dimension_numbers=("NCH", "OIH", "NCH"),
            precision=jax.lax.Precision.HIGHEST)
        out = jnp.maximum(out + b[None, :, None], 0.0)   # bias + ReLU
        pooled.append(jnp.max(out, axis=2))              # (B, O)
    feats = jnp.concatenate(pooled, axis=1)              # (B, FEAT)
    return jnp.dot(feats, wh.T, precision=jax.lax.Precision.HIGHEST) + bh


# ----------------------------------- main ------------------------------------
if __name__ == "__main__":
    key = jax.random.PRNGKey(0)
    keys = jax.random.split(key, 10)

    # Deterministic synthetic parameters (PyTorch shapes).
    emb_table = 0.1 * jax.random.normal(keys[0], (CHAR_VOCAB_SIZE, CHAR_EMB_DIM), jnp.float32)
    conv_ws = [0.1 * jax.random.normal(keys[1 + i], (NUM_KERNELS, CHAR_EMB_DIM, k), jnp.float32)
               for i, k in enumerate(KERNEL_SIZES)]
    conv_bs = [0.1 * jax.random.normal(keys[4 + i], (NUM_KERNELS,), jnp.float32)
               for i in range(len(KERNEL_SIZES))]
    wh = 0.05 * jax.random.normal(keys[7], (HIDDEN, FEAT), jnp.float32)   # Linear weight (out, in)
    bh = 0.05 * jax.random.normal(keys[8], (HIDDEN,), jnp.float32)

    char_ids = jax.random.randint(keys[9], (BATCH, SEQ_LEN), 0, CHAR_VOCAB_SIZE, dtype=jnp.int32)

    consts, bm = pack_params(emb_table, conv_ws, conv_bs, wh, bh, BATCH, SEQ_LEN)
    consts = jax.block_until_ready(consts)
    bm = jax.block_until_ready(bm)

    out = jax.block_until_ready(charcnn_forward(char_ids, consts, bm))
    assert out.shape == (BATCH, HIDDEN), out.shape

    ref = jax.block_until_ready(
        charcnn_reference(char_ids, emb_table, conv_ws, conv_bs, wh, bh))
    np.testing.assert_allclose(np.asarray(out), np.asarray(ref), rtol=5e-3, atol=5e-3)

    print("KERNEL_OK")
</pallas_src>

<mosaic_0001>
module attributes {stable_mosaic.version = 11 : i64} {
  func.func @charcnn_kernel(%arg0: memref<32x1xi32, #tpu.memory_space<vmem>>, %arg1: memref<192x768xbf16, #tpu.memory_space<vmem>>, %arg2: memref<32x128xf32, #tpu.memory_space<vmem>>, %arg3: memref<2x768xf32, #tpu.memory_space<vmem>>) attributes {dimension_semantics = [], scalar_prefetch = 0 : i64, scratch_operands = 0 : i64, tpu.core_type = #tpu.core_type<tc>} {
    %c0 = arith.constant 0 : index
    %c0_0 = arith.constant 0 : index
    %0 = vector.load %arg0[%c0, %c0_0] : memref<32x1xi32, #tpu.memory_space<vmem>>, vector<32x1xi32>
    %1 = tpu.iota {dimensions = array<i32: 1>} : vector<32x64xi32>
    %2 = vector.broadcast %0 : vector<32x1xi32> to vector<32x64xi32>
    %3 = arith.cmpi eq, %2, %1 : vector<32x64xi32>
    %4 = arith.extui %3 : vector<32x64xi1> to vector<32x64xi32>
    %5 = arith.sitofp %4 : vector<32x64xi32> to vector<32x64xf32>
    %6 = arith.truncf %5 : vector<32x64xf32> to vector<32x64xbf16>
    %c0_1 = arith.constant 0 : index
    %c0_2 = arith.constant 0 : index
    %7 = vector.load %arg1[%c0_1, %c0_2] : memref<192x768xbf16, #tpu.memory_space<vmem>>, vector<64x512xbf16>
    %cst = arith.constant dense<0.000000e+00> : vector<32x512xf32>
    %8 = tpu.matmul %6, %7, %cst {dimension_numbers = #tpu.dot_dimension_numbers<[1], [0], [0], [1], [0, 0, 1, 1], [], []>} : vector<32x64xbf16>, vector<64x512xbf16>, vector<32x512xf32> -> vector<32x512xf32>
    %9 = vector.extract_strided_slice %8 {offsets = [0, 0], sizes = [32, 128], strides = [1, 1]} : vector<32x512xf32> to vector<32x128xf32>
    %10 = vector.extract_strided_slice %8 {offsets = [0, 128], sizes = [32, 128], strides = [1, 1]} : vector<32x512xf32> to vector<32x128xf32>
    %c31_i32 = arith.constant 31 : i32
    %11 = tpu.dynamic_rotate %10 by %c31_i32 dim 0 : vector<32x128xf32>, i32 -> vector<32x128xf32>
    %12 = arith.addf %9, %11 : vector<32x128xf32>
    %13 = vector.extract_strided_slice %8 {offsets = [0, 256], sizes = [32, 128], strides = [1, 1]} : vector<32x512xf32> to vector<32x128xf32>
    %c30_i32 = arith.constant 30 : i32
    %14 = tpu.dynamic_rotate %13 by %c30_i32 dim 0 : vector<32x128xf32>, i32 -> vector<32x128xf32>
    %15 = arith.addf %12, %14 : vector<32x128xf32>
    %16 = vector.extract_strided_slice %8 {offsets = [0, 384], sizes = [32, 128], strides = [1, 1]} : vector<32x512xf32> to vector<32x128xf32>
    %c29_i32 = arith.constant 29 : i32
    %17 = tpu.dynamic_rotate %16 by %c29_i32 dim 0 : vector<32x128xf32>, i32 -> vector<32x128xf32>
    %18 = arith.addf %15, %17 : vector<32x128xf32>
    %c0_3 = arith.constant 0 : index
    %c0_4 = arith.constant 0 : index
    %19 = vector.load %arg2[%c0_3, %c0_4] : memref<32x128xf32, #tpu.memory_space<vmem>>, vector<32x128xf32>
    %20 = arith.addf %18, %19 : vector<32x128xf32>
    %cst_5 = arith.constant 0.000000e+00 : f32
    %21 = vector.broadcast %cst_5 : f32 to vector<32x128xf32>
    %22 = arith.maximumf %20, %21 : vector<32x128xf32>
    %23 = vector.shape_cast %22 : vector<32x128xf32> to vector<2x16x128xf32>
    %cst_6 = arith.constant dense<0xFF800000> : vector<2x128xf32>
    %24 = vector.multi_reduction <maximumf>, %23, %cst_6 [1] : vector<2x16x128xf32> to vector<2x128xf32>
    %25 = arith.truncf %24 : vector<2x128xf32> to vector<2x128xbf16>
    %c64 = arith.constant 64 : index
    %c0_7 = arith.constant 0 : index
    %26 = vector.load %arg1[%c64, %c0_7] : memref<192x768xbf16, #tpu.memory_space<vmem>>, vector<128x768xbf16>
    %cst_8 = arith.constant dense<0.000000e+00> : vector<2x768xf32>
    %27 = tpu.matmul %25, %26, %cst_8 {dimension_numbers = #tpu.dot_dimension_numbers<[1], [0], [0], [1], [0, 0, 1, 1], [], []>} : vector<2x128xbf16>, vector<128x768xbf16>, vector<2x768xf32> -> vector<2x768xf32>
    %c0_9 = arith.constant 0 : index
    %c0_10 = arith.constant 0 : index
    %28 = vector.load %arg3[%c0_9, %c0_10] : memref<2x768xf32, #tpu.memory_space<vmem>>, vector<2x768xf32>
    tpu.vector_store %arg3[%c0_9, %c0_10], %27 {strides = array<i32>} : memref<2x768xf32, #tpu.memory_space<vmem>>, vector<2x768xf32>,
    return
  }
}

</mosaic_0001>

<bundles_post_ra>
// kernel: charcnn_forward.1
= control target key start
LH: loop header
LB: loop body
LE: loop exit
PB: predicated region body
PF: predicated region fallthrough
CT: control target
= control target key end

     0   :  { %8 = vsyncpa [#allocation3], 0  ;;  %s1147_s0 = inlined_call_operand.vmem [shape: s32[32,1], index: 0, kind: input, shape index: {}]   ;;  %s1148_s1 = inlined_call_operand.hbm [shape: bf16[192,768], index: 1, kind: input, shape index: {}]   ;;  %s1149_s2 = inlined_call_operand.vmem [shape: f32[32,128], index: 2, kind: input, shape index: {}]   ;;  %s1150_s3 = inlined_call_operand.hbm [shape: f32[2,768], index: 3, kind: output, shape index: {}]  }
   0x1   :  { %9 = vsyncpa [#allocation4], 0  ;;  %s1035_s12 = smov [#allocation2]   ;;  %s987_s16 = scalar_lea.hbm %s1148_s1, 9216 }
   0x2   :  { %s17_s13 = sshll.u32 %s1035_s12, 4  ;;  %p988_p0 = scmp.ne.s32.totalorder %s1148_s1, %s987_s16  ;;  %s18_s13 = int_to_ptr.vmem [resolvable:$true] %s17_s13 }
   0x3   :  { %p991_p1 = scmp.lt.u32.totalorder %s987_s16, %s1148_s1 }
   0x5   :  { %p993_p2 = pnand %p991_p1, %p988_p0 }
   0x7   :  { %996 = shalt.err (!%p993_p2)
}
   0x8   :  { %s997_s21 = scalar_lea.vmem %s18_s13, 9216  ;;  %p1002_p4 = scmp.lt.s32.totalorder %s18_s13, %s18_s13 }
   0x9   :  { %p998_p3 = scmp.ne.s32.totalorder %s18_s13, %s997_s21  ;;  %p1003_p5 = scmp.lt.s32.totalorder %s997_s21, %s997_s21 }
   0xb   :  { %p1004_p6 = por %p1003_p5, %p1002_p4 }
   0xd   :  { %p1005_p7 = pnand %p1004_p6, %p998_p3 }
   0xf   :  { %1008 = shalt.err (!%p1005_p7)
}
  0x10   :  { %s1036_s22 = smov 384   ;;  %s1037_s23 = smov 24  }
  0x11   :  { %23 = dma.hbm_to_vmem [thread:$0]  %s1148_s1, 9216, %s18_s13, [#allocation3], %s1036_s22, %s1036_s22, %s1037_s23  }
  0x12   :  { %1031 = dma.done.wait [#allocation3], 9216  }
  0x13   :  { %1032 = vsyncadd [#allocation3], 4294958080  ;;  %v1038_v0 = vmov 0   ;;  %v30_v1 = vld [vmem:[%s1147_s0] sm:$0xff]  ;;  %v32_v2 = vld [vmem:[%s1147_s0 + $0x10] sm:$0xff]  ;;  %v34_v14 = vlaneseq  ;;  %v1039_v19 = vmov 0.0  }
  0x14   :  { %889 = vset.pattern.permute.xlu0 %v1038_v0  ;;  %890 = vset.pattern.permute.xlu1 %v1038_v0  ;;  %v31_v3 = vld [vmem:[%s1147_s0 + $0x8] sm:$0xff]  ;;  %v33_v4 = vld [vmem:[%s1147_s0 + $0x18] sm:$0xff]  ;;  %vm158_vm2 = vcmask 523264   ;;  %vm392_vm8 = vcmask 1041409  }
  0x15   :  { %197 = vmatprep.mubr.bf16.mxu1 %v1038_v0  ;;  %668 = vmatprep.mubr.bf16.mxu0 %v1038_v0  ;;  %v891_v5 = vld [vmem:[#allocation2 + $0x4] ss:$24 sps:$4 sm:$0xff]   ;;  %v893_v6 = vld [vmem:[#allocation2] ss:$24 sps:$4 sm:$0xff]   ;;  %v894_v7 = vld [vmem:[#allocation2 + $0x34] ss:$24 sps:$4 sm:$0xff]  }
  0x16   :  { %37 = vperm.xlu0 %889, %v30_v1   ;;  %43 = vperm.xlu1 %890, %v32_v2   ;;  %v896_v8 = vld [vmem:[#allocation2 + $0x30] ss:$24 sps:$4 sm:$0xff]   ;;  %v897_v9 = vld [vmem:[#allocation2 + $0x64] ss:$24 sps:$4 sm:$0xff]   ;;  %v899_v10 = vld [vmem:[#allocation2 + $0x60] ss:$24 sps:$4 sm:$0xff]  }
  0x17   :  { %165 = vmatprep.subr.bf16.mxu1 %v891_v5  ;;  %v900_v11 = vld [vmem:[#allocation2 + $0x94] ss:$24 sps:$4 sm:$0xff]   ;;  %v902_v12 = vld [vmem:[#allocation2 + $0x90] ss:$24 sps:$4 sm:$0xff]   ;;  %v35_v15 = vand.u32 127, %v34_v14 }
  0x18   :  { %166 = vmatpush1.bf16.msra.mxu1 %v893_v6  ;;  %v905_v13 = vld [vmem:[#allocation2 + $0xc] ss:$24 sps:$4 sm:$0xff]   ;;  %v903_v22 = vld [vmem:[#allocation2 + $0x8] ss:$24 sps:$4 sm:$0xff]   ;;  %v908_v25 = vld [vmem:[#allocation2 + $0x3c] ss:$24 sps:$4 sm:$0xff]  }
  0x19   :  { %167 = vmatprep.subr.bf16.mxu1 %v894_v7  ;;  %v906_v26 = vld [vmem:[#allocation2 + $0x38] ss:$24 sps:$4 sm:$0xff]   ;;  %v911_v27 = vld [vmem:[#allocation2 + $0x6c] ss:$24 sps:$4 sm:$0xff]   ;;  %v909_v30 = vld [vmem:[#allocation2 + $0x68] ss:$24 sps:$4 sm:$0xff]  }
  0x1a   :  { %40 = vperm.xlu0 %889, %v31_v3   ;;  %46 = vperm.xlu1 %890, %v33_v4   ;;  %v914_v32 = vld [vmem:[#allocation2 + $0x9c] ss:$24 sps:$4 sm:$0xff]   ;;  %v912_v33 = vld [vmem:[#allocation2 + $0x98] ss:$24 sps:$4 sm:$0xff]   ;;  %v920_v36 = vld [vmem:[#allocation2 + $0xcc] ss:$24 sps:$4 sm:$0xff]  }
  0x1b   :  { %v915_v34 = vld [vmem:[#allocation2 + $0xc4] ss:$24 sps:$4 sm:$0xff]   ;;  %v917_v35 = vld [vmem:[#allocation2 + $0xc0] ss:$24 sps:$4 sm:$0xff]   ;;  %v921_v38 = vld [vmem:[#allocation2 + $0xf4] ss:$24 sps:$4 sm:$0xff]  }
  0x1c   :  { %168 = vmatpush1.bf16.msra.mxu1 %v896_v8  ;;  %636 = vmatprep.subr.bf16.mxu0 %v915_v34  ;;  %v918_v37 = vld [vmem:[#allocation2 + $0xc8] ss:$24 sps:$4 sm:$0xff]   ;;  %v926_v40 = vld [vmem:[#allocation2 + $0xfc] ss:$24 sps:$4 sm:$0xff]   ;;  %v924_v41 = vld [vmem:[#allocation2 + $0xf8] ss:$24 sps:$4 sm:$0xff]  }
  0x1d   :  { %169 = vmatprep.subr.bf16.mxu1 %v897_v9  ;;  %637 = vmatpush1.bf16.msra.mxu0 %v917_v35  ;;  %v923_v39 = vld [vmem:[#allocation2 + $0xf0] ss:$24 sps:$4 sm:$0xff]   ;;  %v927_v42 = vld [vmem:[#allocation2 + $0x124] ss:$24 sps:$4 sm:$0xff]   ;;  %v929_v43 = vld [vmem:[#allocation2 + $0x120] ss:$24 sps:$4 sm:$0xff]  }
  0x1e   :  { %638 = vmatprep.subr.bf16.mxu0 %v921_v38  ;;  %v930_v44 = vld [vmem:[#allocation2 + $0x128] ss:$24 sps:$4 sm:$0xff]   ;;  %v932_v45 = vld [vmem:[#allocation2 + $0x12c] ss:$24 sps:$4 sm:$0xff]   ;;  %v938_v48 = vld [vmem:[#allocation2 + $0x15c] ss:$24 sps:$4 sm:$0xff]  }
  0x1f   :  { %v933_v46 = vld [vmem:[#allocation2 + $0x154] ss:$24 sps:$4 sm:$0xff]   ;;  %v935_v47 = vld [vmem:[#allocation2 + $0x150] ss:$24 sps:$4 sm:$0xff]   ;;  %v939_v50 = vld [vmem:[#allocation2 + $0x184] ss:$24 sps:$4 sm:$0xff]  }
  0x20   :  { %170 = vmatpush1.bf16.msra.mxu1 %v899_v10  ;;  %v936_v49 = vld [vmem:[#allocation2 + $0x158] ss:$24 sps:$4 sm:$0xff]   ;;  %v942_v52 = vld [vmem:[#allocation2 + $0x188] ss:$24 sps:$4 sm:$0xff]   ;;  %v944_v53 = vld [vmem:[#allocation2 + $0x18c] ss:$24 sps:$4 sm:$0xff]  }
  0x21   :  { %171 = vmatprep.subr.bf16.mxu1 %v900_v11  ;;  %639 = vmatpush1.bf16.msra.mxu0 %v923_v39  ;;  %v941_v51 = vld [vmem:[#allocation2 + $0x180] ss:$24 sps:$4 sm:$0xff]   ;;  %v945_v54 = vld [vmem:[#allocation2 + $0x1b4] ss:$24 sps:$4 sm:$0xff]   ;;  %v947_v55 = vld [vmem:[#allocation2 + $0x1b0] ss:$24 sps:$4 sm:$0xff]  }
  0x22   :  { %640 = vmatprep.subr.bf16.mxu0 %v927_v42  ;;  %v950_v56 = vld [vmem:[#allocation2 + $0x1bc] ss:$24 sps:$4 sm:$0xff]   ;;  %v948_v58 = vld [vmem:[#allocation2 + $0x1b8] ss:$24 sps:$4 sm:$0xff]   ;;  %v956_v59 = vld [vmem:[#allocation2 + $0x1ec] ss:$24 sps:$4 sm:$0xff]  }
  0x23   :  { %v951_v57 = vld [vmem:[#allocation2 + $0x1e4] ss:$24 sps:$4 sm:$0xff]   ;;  %v953_v60 = vld [vmem:[#allocation2 + $0x1e0] ss:$24 sps:$4 sm:$0xff]   ;;  %v957_v61 = vld [vmem:[#allocation2 + $0x214] ss:$24 sps:$4 sm:$0xff]  }
  0x24   :  { %172 = vmatpush1.bf16.msra.mxu1 %v902_v12  ;;  %v954_v62 = vld [vmem:[#allocation2 + $0x1e8] ss:$24 sps:$4 sm:$0xff]   ;;  %v962_v63 = vld [vmem:[#allocation2 + $0x21c] ss:$24 sps:$4 sm:$0xff]   ;;  %v960_v3 = vld [vmem:[#allocation2 + $0x218] ss:$24 sps:$4 sm:$0xff]  }
  0x25   :  { %218 = vmatprep.subr.bf16.mxu1 %v905_v13  ;;  %641 = vmatpush1.bf16.msra.mxu0 %v929_v43  ;;  %v959_v1 = vld [vmem:[#allocation2 + $0x210] ss:$24 sps:$4 sm:$0xff]   ;;  %v965_v2 = vld [vmem:[#allocation2 + $0xd4] ss:$24 sps:$4 sm:$0xff]   ;;  %v1100_v4 = vshrl.u32 %v34_v14, 7 }
  0x26   :  { %642 = vmatprep.subr.bf16.mxu0 %v933_v46 }
  0x27   :  { %vm277_vm5 = vcmp.lt.s32.totalorder %v1100_v4, 7  ;;  %vm290_vm6 = vcmp.lt.s32.totalorder %v1100_v4, 6  ;;  %vm303_vm7 = vcmp.lt.s32.totalorder %v1100_v4, 5 }
  0x29   :  { %643 = vmatpush1.bf16.msra.mxu0 %v935_v47 }
  0x2a   :  { %644 = vmatprep.subr.bf16.mxu0 %v939_v50  ;;  %v313_v50 = vld [vmem:[%s1149_s2 + $0x8] sm:$0xff] }
  0x2d   :  { %645 = vmatpush1.bf16.msra.mxu0 %v941_v51 }
  0x2e   :  { %646 = vmatprep.subr.bf16.mxu0 %v945_v54 }
  0x31   :  { %647 = vmatpush1.bf16.msra.mxu0 %v947_v55 }
  0x32   :  { %648 = vmatprep.subr.bf16.mxu0 %v951_v57 }
  0x35   :  { %649 = vmatpush1.bf16.msra.mxu0 %v953_v60 }
  0x36   :  { %650 = vmatprep.subr.bf16.mxu0 %v957_v61 }
  0x39   :  { %651 = vmatpush1.bf16.msra.mxu0 %v959_v1 }
  0x3a   :  { %718 = vmatprep.subr.bf16.mxu0 %v965_v2 }
  0x95   :  { %v38_v16 = vpop.permute.xlu0 %37  ;;  %v44_v17 = vpop.permute.xlu1 %43 }
  0x96   :  { %vm48_vm0 = vcmp.eq.s32.totalorder %v38_v16, %v35_v15  ;;  %vm50_vm3 = vcmp.eq.s32.totalorder %v44_v17, %v35_v15 }
  0x97   :  { %v809_v20 = vsel %vm48_vm0, 1.0, %v1039_v19  ;;  %v811_v28 = vsel %vm50_vm3, 1.0, %v1039_v19 }
  0x99   :  { %v41_v18 = vpop.permute.xlu0 %40  ;;  %v47_v23 = vpop.permute.xlu1 %46 }
  0x9a   :  { %vm49_vm1 = vcmp.eq.s32.totalorder %v41_v18, %v35_v15  ;;  %vm51_vm4 = vcmp.eq.s32.totalorder %v47_v23, %v35_v15 }
  0x9b   :  { %v810_v21 = vsel %vm49_vm1, 1.0, %v1039_v19  ;;  %v812_v29 = vsel %vm51_vm4, 1.0, %v1039_v19 }
  0x9c   :  { %v60_v24 = vpack.c.bf16 %v810_v21, %v809_v20  ;;  %v61_v31 = vpack.c.bf16 %v812_v29, %v811_v28 }
  0x9e   :  { %829 = vmatmul.mubr.msk.bf16.vlgmr.msra.gmra.mrb[0].mxu1 %vm158_vm2, %v60_v24 }
  0x9f   :  { %219 = vmatpush1.bf16.msra.mxu1 %v903_v22  ;;  %207 = vmatprep.mubr.bf16.mxu1 %v1038_v0 }
  0xa0   :  { %220 = vmatprep.subr.bf16.mxu1 %v908_v25 }
  0xa3   :  { %221 = vmatpush1.bf16.msra.mxu1 %v906_v26 }
  0xa4   :  { %222 = vmatprep.subr.bf16.mxu1 %v911_v27 }
  0xa6   :  { %830 = vmatmul.mubr.msk.bf16.gmra.mrb[4].mxu1 %vm158_vm2, %v61_v31 }
  0xa7   :  { %223 = vmatpush1.bf16.msra.mxu1 %v909_v30  ;;  %250 = vmatprep.mubr.bf16.mxu1 %v1038_v0 }
  0xa8   :  { %224 = vmatprep.subr.bf16.mxu1 %v914_v32 }
  0xab   :  { %225 = vmatpush1.bf16.msra.mxu1 %v912_v33 }
  0xac   :  { %677 = vmatprep.subr.bf16.mxu1 %v920_v36 }
  0xae   :  { %831 = vmatmul.mubr.msk.bf16.vlgmr.msra.gmra.mrb[8].mxu1 %vm158_vm2, %v60_v24 }
  0xaf   :  { %260 = vmatprep.mubr.bf16.mxu1 %v1038_v0  ;;  %678 = vmatpush1.bf16.msra.mxu1 %v918_v37 }
  0xb0   :  { %679 = vmatprep.subr.bf16.mxu1 %v926_v40  ;;  %v312_v40 = vld [vmem:[%s1149_s2] sm:$0xff] }
  0xb3   :  { %680 = vmatpush1.bf16.msra.mxu1 %v924_v41 }
  0xb4   :  { %681 = vmatprep.subr.bf16.mxu1 %v932_v45 }
  0xb6   :  { %832 = vmatmul.mubr.msk.bf16.gmra.mrb[12].mxu1 %vm158_vm2, %v61_v31 }
  0xb7   :  { %709 = vmatprep.mubr.bf16.mxu1 %v1038_v0  ;;  %682 = vmatpush1.bf16.msra.mxu1 %v930_v44 }
  0xb8   :  { %683 = vmatprep.subr.bf16.mxu1 %v938_v48 }
  0xbb   :  { %684 = vmatpush1.bf16.msra.mxu1 %v936_v49 }
  0xbc   :  { %685 = vmatprep.subr.bf16.mxu1 %v944_v53 }
  0xbf   :  { %686 = vmatpush1.bf16.msra.mxu1 %v942_v52 }
  0xc0   :  { %687 = vmatprep.subr.bf16.mxu1 %v950_v56 }
  0xc3   :  { %688 = vmatpush1.bf16.msra.mxu1 %v948_v58  ;;  %v314_v58 = vld [vmem:[%s1149_s2 + $0x10] sm:$0xff] }
  0xc4   :  { %689 = vmatprep.subr.bf16.mxu1 %v956_v59  ;;  %v315_v59 = vld [vmem:[%s1149_s2 + $0x18] sm:$0xff]  ;;  %s1041_s2 = smov [#allocation5]  }
  0xc5   :  { %s800_s13 = sshll.u32 %s1041_s2, 4  ;;  %s801_s13 = int_to_ptr.vmem [resolvable:$true] %s800_s13 }
  0xc6   :  { %s1009_s14 = scalar_lea.vmem %s801_s13, 192  ;;  %p1014_p9 = scmp.lt.s32.totalorder %s801_s13, %s801_s13 }
  0xc7   :  { %690 = vmatpush1.bf16.msra.mxu1 %v954_v62  ;;  %p1010_p8 = scmp.ne.s32.totalorder %s801_s13, %s1009_s14  ;;  %p1015_p10 = scmp.lt.s32.totalorder %s1009_s14, %s1009_s14 }
  0xc8   :  { %691 = vmatprep.subr.bf16.mxu1 %v962_v63 }
  0xc9   :  { %p1016_p11 = por %p1015_p10, %p1014_p9 }
  0xcb   :  { %692 = vmatpush1.bf16.msra.mxu1 %v960_v3  ;;  %p1017_p12 = pnand %p1016_p11, %p1010_p8 }
 0x171   :  { %v199_v5 = vpop.f32.mrb[0].mxu1 }
 0x172   :  { %v201_v6 = vpop.f32.mrb[1].mxu1 }
 0x173   :  { %v203_v7 = vpop.f32.mrb[2].mxu1  ;;  %v271_v9 = vrot.slane %v201_v6, 1 }
 0x174   :  { %v205_v8 = vpop.f32.mrb[3].mxu1 }
 0x175   :  { %v272_v10 = vrot.slane %v205_v8, 1 }
 0x177   :  { %v280_v11 = vsel %vm277_vm5, %v271_v9, %v272_v10 }
 0x178   :  { %v282_v12 = vadd.f32 %v280_v11, %v199_v5 }
 0x179   :  { %v209_v13 = vpop.f32.mrb[4].mxu1 }
 0x17a   :  { %v211_v15 = vpop.f32.mrb[5].mxu1 }
 0x17b   :  { %v273_v16 = vrot.slane %v211_v15, 1  ;;  %v213_v17 = vpop.f32.mrb[6].mxu1 }
 0x17c   :  { %v215_v18 = vpop.f32.mrb[7].mxu1 }
 0x17d   :  { %v279_v19 = vsel %vm277_vm5, %v272_v10, %v273_v16  ;;  %v274_v20 = vrot.slane %v215_v18, 1 }
 0x17e   :  { %v283_v21 = vadd.f32 %v279_v19, %v203_v7 }
 0x17f   :  { %v278_v14 = vsel %vm277_vm5, %v273_v16, %v274_v20  ;;  %v281_v22 = vsel %vm277_vm5, %v274_v20, %v271_v9 }
 0x180   :  { %v284_v23 = vadd.f32 %v278_v14, %v209_v13  ;;  %v285_v24 = vadd.f32 %v281_v22, %v213_v17 }
 0x181   :  { %v252_v25 = vpop.f32.mrb[8].mxu1 }
 0x182   :  { %v254_v26 = vpop.f32.mrb[9].mxu1  ;;  %v286_v28 = vrot.slane %v252_v25, 2  ;;  %v963_v25 = vld [vmem:[#allocation2 + $0xd0] ss:$24 sps:$4 sm:$0xff]  }
 0x183   :  { %v256_v27 = vpop.f32.mrb[10].mxu1  ;;  %v299_v31 = vrot.slane %v254_v26, 3 }
 0x184   :  { %v287_v29 = vrot.slane %v256_v27, 2  ;;  %v258_v30 = vpop.f32.mrb[11].mxu1 }
 0x185   :  { %v300_v32 = vrot.slane %v258_v30, 3  ;;  %v971_v30 = vld [vmem:[#allocation2 + $0x134] ss:$24 sps:$4 sm:$0xff]  }
 0x186   :  { %v293_v33 = vsel %vm290_vm6, %v286_v28, %v287_v29 }
 0x187   :  { %v295_v34 = vadd.f32 %v293_v33, %v282_v12  ;;  %v306_v35 = vsel %vm303_vm7, %v299_v31, %v300_v32  ;;  %v972_v33 = vld [vmem:[#allocation2 + $0x160] ss:$24 sps:$4 sm:$0xff]  }
 0x189   :  { %v308_v36 = vadd.f32 %v306_v35, %v295_v34  ;;  %v262_v37 = vpop.f32.mrb[12].mxu1  ;;  %v977_v34 = vld [vmem:[#allocation2 + $0x194] ss:$24 sps:$4 sm:$0xff]   ;;  %v975_v35 = vld [vmem:[#allocation2 + $0x190] ss:$24 sps:$4 sm:$0xff]  }
 0x18a   :  { %v288_v38 = vrot.slane %v262_v37, 2  ;;  %v264_v39 = vpop.f32.mrb[13].mxu1  ;;  %v978_v37 = vld [vmem:[#allocation2 + $0x1c0] ss:$24 sps:$4 sm:$0xff]  }
 0x18b   :  { %v301_v41 = vrot.slane %v264_v39, 3  ;;  %v266_v42 = vpop.f32.mrb[14].mxu1  ;;  %v316_v49 = vadd.f32 %v312_v40, %v308_v36  ;;  %v980_v36 = vld [vmem:[#allocation2 + $0x1c4] ss:$24 sps:$4 sm:$0xff]   ;;  %v984_v40 = vld [vmem:[#allocation2 + $0x220] ss:$24 sps:$4 sm:$0xff]  }
 0x18c   :  { %v292_v43 = vsel %vm290_vm6, %v287_v29, %v288_v38  ;;  %v289_v44 = vrot.slane %v266_v42, 2  ;;  %v268_v45 = vpop.f32.mrb[15].mxu1  ;;  %v966_v29 = vld [vmem:[#allocation2 + $0x100] ss:$24 sps:$4 sm:$0xff]   ;;  %v986_v39 = vld [vmem:[#allocation2 + $0x224] ss:$24 sps:$4 sm:$0xff]  }
 0x18d   :  { %v296_v46 = vadd.f32 %v292_v43, %v283_v21  ;;  %v305_v47 = vsel %vm303_vm7, %v300_v32, %v301_v41  ;;  %v302_v48 = vrot.slane %v268_v45, 3  ;;  %v320_v63 = vmax.f32 %v316_v49, 0.0  ;;  %v974_v32 = vld [vmem:[#allocation2 + $0x164] ss:$24 sps:$4 sm:$0xff]  }
 0x18e   :  { %v291_v51 = vsel %vm290_vm6, %v288_v38, %v289_v44  ;;  %v294_v52 = vsel %vm290_vm6, %v289_v44, %v286_v28  ;;  %v968_v28 = vld [vmem:[#allocation2 + $0x104] ss:$24 sps:$4 sm:$0xff]   ;;  %v983_v38 = vld [vmem:[#allocation2 + $0x1f4] ss:$24 sps:$4 sm:$0xff]  }
 0x18f   :  { %v309_v53 = vadd.f32 %v305_v47, %v296_v46  ;;  %v297_v54 = vadd.f32 %v291_v51, %v284_v23  ;;  %v298_v55 = vadd.f32 %v294_v52, %v285_v24  ;;  %v304_v56 = vsel %vm303_vm7, %v301_v41, %v302_v48 }
 0x190   :  { %v307_v57 = vsel %vm303_vm7, %v302_v48, %v299_v31  ;;  %v969_v31 = vld [vmem:[#allocation2 + $0x130] ss:$24 sps:$4 sm:$0xff]   ;;  %v1040_v41 = vmov 1983009808  }
 0x191   :  { %v317_v60 = vadd.f32 %v313_v50, %v309_v53  ;;  %v310_v61 = vadd.f32 %v304_v56, %v297_v54  ;;  %v311_v62 = vadd.f32 %v307_v57, %v298_v55  ;;  %v768_v42 = vunpack.c.l.s4 %v1040_v41 }
 0x193   :  { %v321_v1 = vmax.f32 %v317_v60, 0.0  ;;  %v318_v2 = vadd.f32 %v314_v58, %v310_v61  ;;  %v319_v3 = vadd.f32 %v315_v59, %v311_v62  ;;  %v769_v43 = vunpack.c.0.s8 %v768_v42 }
 0x195   :  { %v324_v5 = vmax.f32 %v320_v63, %v321_v1  ;;  %v322_v6 = vmax.f32 %v318_v2, 0.0  ;;  %v323_v7 = vmax.f32 %v319_v3, 0.0  ;;  %v772_v46 = vsub.s32 %v769_v43, %v1100_v4 }
 0x197   :  { %v325_v8 = vrot.slane %v324_v5, 4  ;;  %v331_v9 = vmax.f32 %v322_v6, %v323_v7 }
 0x199   :  { %v326_v10 = vmax.f32 %v324_v5, %v325_v8  ;;  %v332_v11 = vrot.slane %v331_v9, 4 }
 0x19b   :  { %v333_v12 = vmax.f32 %v331_v9, %v332_v11  ;;  %v327_v13 = vrot.slane %v326_v10, 2 }
 0x19d   :  { %v328_v15 = vmax.f32 %v326_v10, %v327_v13  ;;  %v334_v16 = vrot.slane %v333_v12, 2 }
 0x19f   :  { %v329_v17 = vrot.slane %v328_v15, 1  ;;  %v335_v18 = vmax.f32 %v333_v12, %v334_v16 }
 0x1a1   :  { %v330_v19 = vmax.f32 %v328_v15, %v329_v17  ;;  %v336_v20 = vrot.slane %v335_v18, 1 }
 0x1a3   :  { %v337_v21 = vmax.f32 %v335_v18, %v336_v20  ;;  %v338_v14 = vpack.c.bf16 %v330_v19, %v330_v19 }
 0x1a5   :  { %v339_v22 = vpack.c.bf16 %v337_v21, %v337_v21  ;;  %v390_v23 = vunpack.c.l.b16 %v338_v14 }
 0x1a7   :  { %v391_v24 = vunpack.c.l.b16 %v339_v22 }
 0x1a9   :  { %v393_v26 = vsel %vm392_vm8, %v391_v24, %v390_v23 }
 0x1aa   :  { %v394_v27 = vpack.c.b16 %v393_v26, %v393_v26 }
 0x1ac   :  { %669 = vmatmul.mubr.bf16.vlgmr.msra.gmra.mrb[0].mxu0 %v394_v27  ;;  %710 = vmatmul.mubr.bf16.vlgmr.msra.gmra.mrb[16].mxu1 %v394_v27 }
 0x1ad   :  { %719 = vmatpush1.bf16.msra.mxu0 %v963_v25  ;;  %750 = vmatprep.mubr.bf16.mxu0 %v1038_v0  ;;  %v981_v0 = vld [vmem:[#allocation2 + $0x1f0] ss:$24 sps:$4 sm:$0xff]  }
 0x1ae   :  { %720 = vmatprep.subr.bf16.mxu0 %v968_v28 }
 0x1b1   :  { %721 = vmatpush1.bf16.msra.mxu0 %v966_v29 }
 0x1b2   :  { %722 = vmatprep.subr.bf16.mxu0 %v971_v30 }
 0x1b5   :  { %723 = vmatpush1.bf16.msra.mxu0 %v969_v31 }
 0x1b6   :  { %724 = vmatprep.subr.bf16.mxu0 %v974_v32 }
 0x1b9   :  { %725 = vmatpush1.bf16.msra.mxu0 %v972_v33 }
 0x1ba   :  { %726 = vmatprep.subr.bf16.mxu0 %v977_v34 }
 0x1bd   :  { %727 = vmatpush1.bf16.msra.mxu0 %v975_v35 }
 0x1be   :  { %728 = vmatprep.subr.bf16.mxu0 %v980_v36 }
 0x1c1   :  { %729 = vmatpush1.bf16.msra.mxu0 %v978_v37 }
 0x1c2   :  { %730 = vmatprep.subr.bf16.mxu0 %v983_v38 }
 0x1c5   :  { %731 = vmatpush1.bf16.msra.mxu0 %v981_v0 }
 0x1c6   :  { %732 = vmatprep.subr.bf16.mxu0 %v986_v39 }
 0x1c9   :  { %733 = vmatpush1.bf16.msra.mxu0 %v984_v40 }
 0x1cc   :  { %751 = vmatmul.mubr.bf16.vlgmr.msra.gmra.mrb[4].mxu0 %v394_v27 }
 0x27f   :  { %v670_v44 = vpop.f32.mrb[0].mxu0  ;;  %v711_v45 = vpop.f32.mrb[16].mxu1 }
 0x280   :  { %v672_v47 = vpop.f32.mrb[1].mxu0  ;;  %v713_v48 = vpop.f32.mrb[17].mxu1 }
 0x281   :  { %v765_v49 = vcombine.low %v670_v44, %v672_v47  ;;  %v766_v50 = vcombine.low %v711_v45, %v713_v48  ;;  %v674_v51 = vpop.f32.mrb[2].mxu0  ;;  %v715_v52 = vpop.f32.mrb[18].mxu1 }
 0x282   :  { %v675_v53 = vpop.f32.mrb[3].mxu0  ;;  %v716_v54 = vpop.f32.mrb[19].mxu1 }
 0x283   :  { %v773_v55 = vrot.slane %v765_v49, %v772_v46  ;;  %v780_v56 = vrot.slane %v766_v50, %v772_v46 }
 0x285   :  { %v781_v57 = vcombine.low %v773_v55, %v780_v56 }
 0x287   :  { %792 = vst [vmem:[#allocation5] sm:$0xff] %v781_v57 }
 0x29f   :  { %v752_v58 = vpop.f32.mrb[4].mxu0 }
 0x2a0   :  { %v754_v59 = vpop.f32.mrb[5].mxu0 }
 0x2a1   :  { %v782_v60 = vcombine.low %v752_v58, %v754_v59  ;;  %v756_v61 = vpop.f32.mrb[6].mxu0 }
 0x2a2   :  { %v757_v4 = vpop.f32.mrb[7].mxu0 }
 0x2a3   :  { %881 = vst.sshfl [vmem:[#allocation5 + $0x8] sm:$0x33 pattern:$0x76325410] %v782_v60 }
 0x2a4   :  { %1020 = shalt.err (!%p1017_p12)
}
 0x2a5   :  { %s1021_s17 = scalar_lea.hbm %s1150_s3, 192 }
 0x2a6   :  { %p1022_p13 = scmp.ne.s32.totalorder %s1150_s3, %s1021_s17  ;;  %p1025_p0 = scmp.lt.u32.totalorder %s1021_s17, %s1150_s3 }
 0x2a8   :  { %p1027_p1 = pnand %p1025_p0, %p1022_p13 }
 0x2aa   :  { %1030 = shalt.err (!%p1027_p1)
}
 0x2ab   :  { %803 = dma.vmem_to_hbm [thread:$0]  %s801_s13, 192, %s1150_s3, [#allocation4]  }
 0x2ac   :  { %1033 = dma.done.wait [#allocation4], 192  }
 0x2ad   :  { %1034 = vsyncadd [#allocation4], 4294967104 }
 0x2ae   :  { %807 = vsyncpa [#allocation3], 1 }
 0x2af   :  { %808 = vsyncpa [#allocation4], 1 }

</bundles_post_ra>
